<compile_context>
chip_gen: v6e
topology: v6e:2x2x1
jax: 0.10.0
libtpu: 0.0.40
codegen_flags: <defaults>
</compile_context>

<pallas_src>
import jax
import jax.numpy as jnp
from jax.experimental import pallas as pl
from jax.experimental.pallas import tpu as pltpu


def _round_up(x, m):
    return (x + m - 1) // m * m


# ----------------------------------------------------------------------------
# Kernel: all L GRU layers in one invocation (no grid).
# Shapes (Ep = E padded to a multiple of 128, G = 3*Ep):
#   hidden, context : (B, Ep)   f32
#   w_ih            : (L, Ep, G) bf16   per-layer input-path weights  [r|z|n]
#   w_hh            : (Ep, L*G)  bf16   ALL layers' hidden-path weights, fused
#   b_ih            : (L, 1, G)  f32
#   b_hh            : (1, L*G)   f32
#   out             : (B, Ep)    f32
# ----------------------------------------------------------------------------
def gru_stack_kernel(hidden_ref, context_ref, w_ih_ref, w_hh_ref,
                     b_ih_ref, b_hh_ref, out_ref):
    Ep = hidden_ref.shape[-1]
    G = 3 * Ep
    num_layers = w_ih_ref.shape[0]

    h0 = hidden_ref[...]                         # (B, Ep), shared by all layers
    h0_bf = h0.astype(jnp.bfloat16)

    # Hoisted hidden-path projection: ONE MXU call for all layers & all gates.
    gh_all = jnp.dot(h0_bf, w_hh_ref[...],
                     preferred_element_type=jnp.float32) + b_hh_ref[...]  # (B, L*G)

    # L is small & static -> plain Python loop, all slices static / tile-aligned.
    x = context_ref[...]
    for l in range(num_layers):
        gi = jnp.dot(x.astype(jnp.bfloat16), w_ih_ref[l],
                     preferred_element_type=jnp.float32) + b_ih_ref[l]    # (B, G)
        gh = gh_all[:, l * G:(l + 1) * G]                                 # (B, G)

        # Gate slices land on 128-lane tile boundaries (stride Ep).
        r = jax.nn.sigmoid(gi[:, 0 * Ep:1 * Ep] + gh[:, 0 * Ep:1 * Ep])
        z = jax.nn.sigmoid(gi[:, 1 * Ep:2 * Ep] + gh[:, 1 * Ep:2 * Ep])
        n = jnp.tanh(gi[:, 2 * Ep:3 * Ep] + r * gh[:, 2 * Ep:3 * Ep])
        x = (1.0 - z) * n + z * h0

    out_ref[...] = x


# ----------------------------------------------------------------------------
# Host-side packing of PyTorch-layout GRU params into the kernel layout.
#   w_ih, w_hh: (L, E, 3E)  == stacked weight_{ih,hh}_l{k}.T  (columns [r|z|n])
#   b_ih, b_hh: (L, 3E)
# ----------------------------------------------------------------------------
def pack_gru_params(w_ih, w_hh, b_ih, b_hh, *, weight_dtype=jnp.bfloat16):
    L, E, E3 = w_ih.shape
    assert E3 == 3 * E
    Ep = _round_up(E, 128)
    G = 3 * Ep

    wih_g = w_ih.reshape(L, E, 3, E)
    whh_g = w_hh.reshape(L, E, 3, E)
    bih_g = b_ih.reshape(L, 3, E)
    bhh_g = b_hh.reshape(L, 3, E)

    w_ih_p = jnp.zeros((L, Ep, G), jnp.float32)
    w_hh_p = jnp.zeros((Ep, L * G), jnp.float32)
    b_ih_p = jnp.zeros((L, 1, G), jnp.float32)
    b_hh_p = jnp.zeros((1, L * G), jnp.float32)

    for g in range(3):
        w_ih_p = w_ih_p.at[:, :E, g * Ep:g * Ep + E].set(wih_g[:, :, g, :])
        b_ih_p = b_ih_p.at[:, 0, g * Ep:g * Ep + E].set(bih_g[:, g, :])
        for l in range(L):
            c0 = l * G + g * Ep
            w_hh_p = w_hh_p.at[:E, c0:c0 + E].set(whh_g[l, :, g, :])
            b_hh_p = b_hh_p.at[0, c0:c0 + E].set(bhh_g[l, g, :])

    return (w_ih_p.astype(weight_dtype), w_hh_p.astype(weight_dtype),
            b_ih_p, b_hh_p)


def _vmem_limit_bytes(resident_bytes):
    """Scoped-VMEM limit: enough for the resident weights (+ headroom) but
    never more than ~90% of physical VMEM (v7x has only 64 MiB)."""
    cap = 64 * 1024 * 1024
    try:
        info = pltpu.get_tpu_info()
        cap = getattr(info, "vmem_capacity_bytes", cap)
    except Exception:
        pass
    want = max(16 * 1024 * 1024, 2 * int(resident_bytes))
    return int(min(int(0.9 * cap), want))


def rnn_decoder_forward(hidden, context, packed_params):
    """hidden: (1, B, E) or (B, E); context: (B, E). Returns (B, E) float32."""
    if hidden.ndim == 3:
        hidden = hidden[0]
    w_ih_p, w_hh_p, b_ih_p, b_hh_p = packed_params
    L, Ep, G = w_ih_p.shape
    B, E = context.shape

    # Pad activations to the lane-aligned width only when needed.
    if E == Ep:
        hidden_p = hidden.astype(jnp.float32)
        context_p = context.astype(jnp.float32)
    else:
        hidden_p = jnp.zeros((B, Ep), jnp.float32).at[:, :E].set(
            hidden.astype(jnp.float32))
        context_p = jnp.zeros((B, Ep), jnp.float32).at[:, :E].set(
            context.astype(jnp.float32))

    weight_bytes = (w_ih_p.size * w_ih_p.dtype.itemsize
                    + w_hh_p.size * w_hh_p.dtype.itemsize
                    + b_ih_p.size * 4 + b_hh_p.size * 4)
    act_bytes = 3 * B * Ep * 4
    cost = pl.CostEstimate(
        flops=int(12 * L * B * Ep * Ep),            # 2 dots x 3Ep cols x L layers
        transcendentals=int(3 * L * B * Ep),        # 2 sigmoid + 1 tanh per layer
        bytes_accessed=int(weight_bytes + act_bytes))

    out = pl.pallas_call(
        gru_stack_kernel,
        out_shape=jax.ShapeDtypeStruct((B, Ep), jnp.float32),
        in_specs=[pl.BlockSpec(memory_space=pltpu.MemorySpace.VMEM)] * 6,
        out_specs=pl.BlockSpec(memory_space=pltpu.MemorySpace.VMEM),
        compiler_params=pltpu.CompilerParams(
            vmem_limit_bytes=_vmem_limit_bytes(weight_bytes + act_bytes)),
        cost_estimate=cost,
    )(hidden_p, context_p, w_ih_p, w_hh_p, b_ih_p, b_hh_p)

    return out if E == Ep else out[:, :E]


# ----------------------------------------------------------------------------
# Pure-JAX reference with PyTorch GRU semantics (for verification).
# ----------------------------------------------------------------------------
def gru_reference(hidden, context, w_ih, w_hh, b_ih, b_hh, *, dot_dtype=None):
    if hidden.ndim == 3:
        hidden = hidden[0]
    L, E, _ = w_ih.shape

    def cast(a):
        return a.astype(dot_dtype).astype(jnp.float32) if dot_dtype is not None else a

    h0 = hidden
    x = context
    for l in range(L):
        gi = jnp.dot(cast(x), cast(w_ih[l])) + b_ih[l]
        gh = jnp.dot(cast(h0), cast(w_hh[l])) + b_hh[l]
        r = jax.nn.sigmoid(gi[:, :E] + gh[:, :E])
        z = jax.nn.sigmoid(gi[:, E:2 * E] + gh[:, E:2 * E])
        n = jnp.tanh(gi[:, 2 * E:] + r * gh[:, 2 * E:])
        x = (1.0 - z) * n + z * h0
    return x


if __name__ == "__main__":
    B = 8     # batch
    E = 32    # embed_size (= GRU hidden size)
    L = 2     # num_layers

    key = jax.random.PRNGKey(0)
    ks = jax.random.split(key, 6)
    bound = 1.0 / (E ** 0.5)   # PyTorch GRU init range U(-1/sqrt(H), 1/sqrt(H))

    # PyTorch-layout parameters, pre-transposed: (L, E, 3E) == weight_*.T stacked.
    w_ih = jax.random.uniform(ks[0], (L, E, 3 * E), jnp.float32, -bound, bound)
    w_hh = jax.random.uniform(ks[1], (L, E, 3 * E), jnp.float32, -bound, bound)
    b_ih = jax.random.uniform(ks[2], (L, 3 * E), jnp.float32, -bound, bound)
    b_hh = jax.random.uniform(ks[3], (L, 3 * E), jnp.float32, -bound, bound)

    # Module inputs: hidden (1, B, E) (expanded to all layers), context (B, E).
    hidden = jax.random.normal(ks[4], (1, B, E), jnp.float32)
    context = jax.random.normal(ks[5], (B, E), jnp.float32)

    packed = pack_gru_params(w_ih, w_hh, b_ih, b_hh, weight_dtype=jnp.bfloat16)
    out = rnn_decoder_forward(hidden, context, packed)
    out = jax.block_until_ready(out)
    assert out.shape == (B, E)

    # Tight check vs a reference that mirrors the kernel's bf16 dot operands.
    ref_bf = gru_reference(hidden, context, w_ih, w_hh, b_ih, b_hh,
                           dot_dtype=jnp.bfloat16)
    assert jnp.allclose(out, ref_bf, atol=3e-3, rtol=3e-3), \
        float(jnp.max(jnp.abs(out - ref_bf)))

    # Fidelity check vs the pure-f32 PyTorch-semantics reference (bf16 weights
    # introduce only small rounding).
    ref_f32 = gru_reference(hidden, context, w_ih, w_hh, b_ih, b_hh)
    assert jnp.allclose(out, ref_f32, atol=5e-2, rtol=0.0), \
        float(jnp.max(jnp.abs(out - ref_f32)))

    print("KERNEL_OK")
</pallas_src>

<mosaic_0001>
module attributes {stable_mosaic.version = 11 : i64} {
  func.func @gru_stack_kernel(%arg0: memref<8x128xf32, #tpu.memory_space<vmem>>, %arg1: memref<8x128xf32, #tpu.memory_space<vmem>>, %arg2: memref<2x128x384xbf16, #tpu.memory_space<vmem>>, %arg3: memref<128x768xbf16, #tpu.memory_space<vmem>>, %arg4: memref<2x1x384xf32, #tpu.memory_space<vmem>>, %arg5: memref<1x768xf32, #tpu.memory_space<vmem>>, %arg6: memref<8x128xf32, #tpu.memory_space<vmem>>) attributes {dimension_semantics = [], scalar_prefetch = 0 : i64, scratch_operands = 0 : i64, tpu.core_type = #tpu.core_type<tc>} {
    %c0 = arith.constant 0 : index
    %c0_0 = arith.constant 0 : index
    %0 = vector.load %arg0[%c0, %c0_0] : memref<8x128xf32, #tpu.memory_space<vmem>>, vector<8x128xf32>
    %1 = arith.truncf %0 : vector<8x128xf32> to vector<8x128xbf16>
    %c0_1 = arith.constant 0 : index
    %c0_2 = arith.constant 0 : index
    %2 = vector.load %arg3[%c0_1, %c0_2] : memref<128x768xbf16, #tpu.memory_space<vmem>>, vector<128x768xbf16>
    %cst = arith.constant dense<0.000000e+00> : vector<8x768xf32>
    %3 = tpu.matmul %1, %2, %cst {dimension_numbers = #tpu.dot_dimension_numbers<[1], [0], [0], [1], [0, 0, 1, 1], [], []>} : vector<8x128xbf16>, vector<128x768xbf16>, vector<8x768xf32> -> vector<8x768xf32>
    %c0_3 = arith.constant 0 : index
    %c0_4 = arith.constant 0 : index
    %4 = vector.load %arg5[%c0_3, %c0_4] : memref<1x768xf32, #tpu.memory_space<vmem>>, vector<1x768xf32>
    %5 = vector.broadcast %4 : vector<1x768xf32> to vector<8x768xf32>
    %6 = arith.addf %3, %5 : vector<8x768xf32>
    %c0_5 = arith.constant 0 : index
    %c0_6 = arith.constant 0 : index
    %7 = vector.load %arg1[%c0_5, %c0_6] : memref<8x128xf32, #tpu.memory_space<vmem>>, vector<8x128xf32>
    %8 = arith.truncf %7 : vector<8x128xf32> to vector<8x128xbf16>
    %c0_7 = arith.constant 0 : index
    %c0_8 = arith.constant 0 : index
    %c0_9 = arith.constant 0 : index
    %9 = vector.load %arg2[%c0_7, %c0_8, %c0_9] : memref<2x128x384xbf16, #tpu.memory_space<vmem>>, vector<1x128x384xbf16>
    %10 = vector.shape_cast %9 : vector<1x128x384xbf16> to vector<128x384xbf16>
    %cst_10 = arith.constant dense<0.000000e+00> : vector<8x384xf32>
    %11 = tpu.matmul %8, %10, %cst_10 {dimension_numbers = #tpu.dot_dimension_numbers<[1], [0], [0], [1], [0, 0, 1, 1], [], []>} : vector<8x128xbf16>, vector<128x384xbf16>, vector<8x384xf32> -> vector<8x384xf32>
    %c0_11 = arith.constant 0 : index
    %c0_12 = arith.constant 0 : index
    %c0_13 = arith.constant 0 : index
    %12 = vector.load %arg4[%c0_11, %c0_12, %c0_13] : memref<2x1x384xf32, #tpu.memory_space<vmem>>, vector<1x1x384xf32>
    %13 = vector.shape_cast %12 : vector<1x1x384xf32> to vector<1x384xf32>
    %14 = vector.broadcast %13 : vector<1x384xf32> to vector<8x384xf32>
    %15 = arith.addf %11, %14 : vector<8x384xf32>
    %16 = vector.extract_strided_slice %6 {offsets = [0, 0], sizes = [8, 384], strides = [1, 1]} : vector<8x768xf32> to vector<8x384xf32>
    %17 = vector.extract_strided_slice %15 {offsets = [0, 0], sizes = [8, 128], strides = [1, 1]} : vector<8x384xf32> to vector<8x128xf32>
    %18 = vector.extract_strided_slice %16 {offsets = [0, 0], sizes = [8, 128], strides = [1, 1]} : vector<8x384xf32> to vector<8x128xf32>
    %19 = arith.addf %17, %18 : vector<8x128xf32>
    %20 = arith.negf %19 : vector<8x128xf32>
    %21 = math.exp %20 : vector<8x128xf32>
    %cst_14 = arith.constant 1.000000e+00 : f32
    %22 = vector.broadcast %cst_14 : f32 to vector<8x128xf32>
    %23 = arith.addf %22, %21 : vector<8x128xf32>
    %24 = arith.divf %22, %23 : vector<8x128xf32>
    %25 = vector.extract_strided_slice %15 {offsets = [0, 128], sizes = [8, 128], strides = [1, 1]} : vector<8x384xf32> to vector<8x128xf32>
    %26 = vector.extract_strided_slice %16 {offsets = [0, 128], sizes = [8, 128], strides = [1, 1]} : vector<8x384xf32> to vector<8x128xf32>
    %27 = arith.addf %25, %26 : vector<8x128xf32>
    %28 = arith.negf %27 : vector<8x128xf32>
    %29 = math.exp %28 : vector<8x128xf32>
    %cst_15 = arith.constant 1.000000e+00 : f32
    %30 = vector.broadcast %cst_15 : f32 to vector<8x128xf32>
    %31 = arith.addf %30, %29 : vector<8x128xf32>
    %32 = arith.divf %30, %31 : vector<8x128xf32>
    %33 = vector.extract_strided_slice %15 {offsets = [0, 256], sizes = [8, 128], strides = [1, 1]} : vector<8x384xf32> to vector<8x128xf32>
    %34 = vector.extract_strided_slice %16 {offsets = [0, 256], sizes = [8, 128], strides = [1, 1]} : vector<8x384xf32> to vector<8x128xf32>
    %35 = arith.mulf %24, %34 : vector<8x128xf32>
    %36 = arith.addf %33, %35 : vector<8x128xf32>
    %37 = math.tanh %36 : vector<8x128xf32>
    %cst_16 = arith.constant 1.000000e+00 : f32
    %38 = vector.broadcast %cst_16 : f32 to vector<8x128xf32>
    %39 = arith.subf %38, %32 : vector<8x128xf32>
    %40 = arith.mulf %39, %37 : vector<8x128xf32>
    %41 = arith.mulf %32, %0 : vector<8x128xf32>
    %42 = arith.addf %40, %41 : vector<8x128xf32>
    %43 = arith.truncf %42 : vector<8x128xf32> to vector<8x128xbf16>
    %c1 = arith.constant 1 : index
    %c0_17 = arith.constant 0 : index
    %c0_18 = arith.constant 0 : index
    %44 = vector.load %arg2[%c1, %c0_17, %c0_18] : memref<2x128x384xbf16, #tpu.memory_space<vmem>>, vector<1x128x384xbf16>
    %45 = vector.shape_cast %44 : vector<1x128x384xbf16> to vector<128x384xbf16>
    %cst_19 = arith.constant dense<0.000000e+00> : vector<8x384xf32>
    %46 = tpu.matmul %43, %45, %cst_19 {dimension_numbers = #tpu.dot_dimension_numbers<[1], [0], [0], [1], [0, 0, 1, 1], [], []>} : vector<8x128xbf16>, vector<128x384xbf16>, vector<8x384xf32> -> vector<8x384xf32>
    %c1_20 = arith.constant 1 : index
    %c0_21 = arith.constant 0 : index
    %c0_22 = arith.constant 0 : index
    %47 = vector.load %arg4[%c1_20, %c0_21, %c0_22] : memref<2x1x384xf32, #tpu.memory_space<vmem>>, vector<1x1x384xf32>
    %48 = vector.shape_cast %47 : vector<1x1x384xf32> to vector<1x384xf32>
    %49 = vector.broadcast %48 : vector<1x384xf32> to vector<8x384xf32>
    %50 = arith.addf %46, %49 : vector<8x384xf32>
    %51 = vector.extract_strided_slice %6 {offsets = [0, 384], sizes = [8, 384], strides = [1, 1]} : vector<8x768xf32> to vector<8x384xf32>
    %52 = vector.extract_strided_slice %50 {offsets = [0, 0], sizes = [8, 128], strides = [1, 1]} : vector<8x384xf32> to vector<8x128xf32>
    %53 = vector.extract_strided_slice %51 {offsets = [0, 0], sizes = [8, 128], strides = [1, 1]} : vector<8x384xf32> to vector<8x128xf32>
    %54 = arith.addf %52, %53 : vector<8x128xf32>
    %55 = arith.negf %54 : vector<8x128xf32>
    %56 = math.exp %55 : vector<8x128xf32>
    %cst_23 = arith.constant 1.000000e+00 : f32
    %57 = vector.broadcast %cst_23 : f32 to vector<8x128xf32>
    %58 = arith.addf %57, %56 : vector<8x128xf32>
    %59 = arith.divf %57, %58 : vector<8x128xf32>
    %60 = vector.extract_strided_slice %50 {offsets = [0, 128], sizes = [8, 128], strides = [1, 1]} : vector<8x384xf32> to vector<8x128xf32>
    %61 = vector.extract_strided_slice %51 {offsets = [0, 128], sizes = [8, 128], strides = [1, 1]} : vector<8x384xf32> to vector<8x128xf32>
    %62 = arith.addf %60, %61 : vector<8x128xf32>
    %63 = arith.negf %62 : vector<8x128xf32>
    %64 = math.exp %63 : vector<8x128xf32>
    %cst_24 = arith.constant 1.000000e+00 : f32
    %65 = vector.broadcast %cst_24 : f32 to vector<8x128xf32>
    %66 = arith.addf %65, %64 : vector<8x128xf32>
    %67 = arith.divf %65, %66 : vector<8x128xf32>
    %68 = vector.extract_strided_slice %50 {offsets = [0, 256], sizes = [8, 128], strides = [1, 1]} : vector<8x384xf32> to vector<8x128xf32>
    %69 = vector.extract_strided_slice %51 {offsets = [0, 256], sizes = [8, 128], strides = [1, 1]} : vector<8x384xf32> to vector<8x128xf32>
    %70 = arith.mulf %59, %69 : vector<8x128xf32>
    %71 = arith.addf %68, %70 : vector<8x128xf32>
    %72 = math.tanh %71 : vector<8x128xf32>
    %cst_25 = arith.constant 1.000000e+00 : f32
    %73 = vector.broadcast %cst_25 : f32 to vector<8x128xf32>
    %74 = arith.subf %73, %67 : vector<8x128xf32>
    %75 = arith.mulf %74, %72 : vector<8x128xf32>
    %76 = arith.mulf %67, %0 : vector<8x128xf32>
    %77 = arith.addf %75, %76 : vector<8x128xf32>
    %c0_26 = arith.constant 0 : index
    %c0_27 = arith.constant 0 : index
    %78 = vector.load %arg6[%c0_26, %c0_27] : memref<8x128xf32, #tpu.memory_space<vmem>>, vector<8x128xf32>
    tpu.vector_store %arg6[%c0_26, %c0_27], %77 {strides = array<i32>} : memref<8x128xf32, #tpu.memory_space<vmem>>, vector<8x128xf32>,
    return
  }
}

</mosaic_0001>

<bundles_post_ra>
// kernel: tpu_custom_call.1
= control target key start
LH: loop header
LB: loop body
LE: loop exit
PB: predicated region body
PF: predicated region fallthrough
CT: control target
= control target key end

     0   :  { %11 = vsyncpa [#allocation3], 0  ;;  %s1712_s0 = inlined_call_operand.hbm [shape: f32[8,128], index: 0, kind: input, shape index: {}]   ;;  %s1713_s1 = inlined_call_operand.hbm [shape: f32[8,128], index: 1, kind: input, shape index: {}]   ;;  %s1714_s2 = inlined_call_operand.hbm [shape: bf16[2,128,384], index: 2, kind: input, shape index: {}]   ;;  %s1715_s3 = inlined_call_operand.hbm [shape: bf16[128,768], index: 3, kind: input, shape index: {}]   ;;  %s1716_s4 = inlined_call_operand.vmem [shape: f32[2,1,384], index: 4, kind: input, shape index: {}]   ;;  %s1717_s5 = inlined_call_operand.hbm [shape: f32[1,768], index: 5, kind: input, shape index: {}]   ;;  %s1718_s6 = inlined_call_operand.hbm [shape: f32[8,128], index: 6, kind: output, shape index: {}]  }
   0x1   :  { %12 = vsyncpa [#allocation6], 0 }
   0x2   :  { %13 = vsyncpa [#allocation9], 0 }
   0x3   :  { %14 = vsyncpa [#allocation4], 0  ;;  %s1569_s21 = smov [#allocation5]   ;;  %s1570_s23 = smov [#allocation8]  }
   0x4   :  { %s31_s22 = sshll.u32 %s1569_s21, 4  ;;  %s52_s24 = sshll.u32 %s1570_s23, 4  ;;  %s32_s22 = int_to_ptr.vmem [resolvable:$true] %s31_s22  ;;  %s53_s24 = int_to_ptr.vmem [resolvable:$true] %s52_s24 }
   0x5   :  { %s1449_s25 = scalar_lea.vmem %s32_s22, 128  ;;  %p1454_p1 = scmp.lt.s32.totalorder %s32_s22, %s32_s22 }
   0x6   :  { %p1450_p0 = scmp.ne.s32.totalorder %s32_s22, %s1449_s25  ;;  %p1455_p2 = scmp.lt.s32.totalorder %s1449_s25, %s1449_s25 }
   0x8   :  { %p1456_p3 = por %p1455_p2, %p1454_p1 }
   0xa   :  { %p1457_p4 = pnand %p1456_p3, %p1450_p0 }
   0xc   :  { %1460 = shalt.err (!%p1457_p4)
}
   0xd   :  { %34 = dma.hbm_to_vmem [thread:$0]  %s1713_s1, 128, %s32_s22, [#allocation6]  }
   0xe   :  { %s1469_s28 = scalar_lea.vmem %s53_s24, 6144  ;;  %p1474_p6 = scmp.lt.s32.totalorder %s53_s24, %s53_s24 }
   0xf   :  { %p1470_p5 = scmp.ne.s32.totalorder %s53_s24, %s1469_s28  ;;  %p1475_p7 = scmp.lt.s32.totalorder %s1469_s28, %s1469_s28 }
  0x11   :  { %p1476_p8 = por %p1475_p7, %p1474_p6 }
  0x13   :  { %p1477_p9 = pnand %p1476_p8, %p1470_p5 }
  0x15   :  { %1480 = shalt.err (!%p1477_p9)
}
  0x16   :  { %s1571_s29 = smov 384   ;;  %s1572_s30 = smov 24  }
  0x17   :  { %58 = dma.hbm_to_vmem [thread:$0]  %s1715_s3, 6144, %s53_s24, [#allocation9], %s1571_s29, %s1571_s29, %s1572_s30  }
  0x18   :  { %s1573_s9 = smov [#allocation2]   ;;  %s1574_s11 = smov [#allocation7]  }
  0x19   :  { %s21_s10 = sshll.u32 %s1573_s9, 4  ;;  %s40_s12 = sshll.u32 %s1574_s11, 4  ;;  %s22_s10 = int_to_ptr.vmem [resolvable:$true] %s21_s10  ;;  %s41_s12 = int_to_ptr.vmem [resolvable:$true] %s40_s12 }
  0x1a   :  { %s1489_s1 = scalar_lea.vmem %s22_s10, 128  ;;  %p1494_p11 = scmp.lt.s32.totalorder %s22_s10, %s22_s10 }
  0x1b   :  { %p1490_p10 = scmp.ne.s32.totalorder %s22_s10, %s1489_s1  ;;  %p1495_p12 = scmp.lt.s32.totalorder %s1489_s1, %s1489_s1 }
  0x1d   :  { %p1496_p13 = por %p1495_p12, %p1494_p11 }
  0x1f   :  { %p1497_p0 = pnand %p1496_p13, %p1490_p10 }
  0x21   :  { %1500 = shalt.err (!%p1497_p0)
}
  0x22   :  { %24 = dma.hbm_to_vmem [thread:$0]  %s1712_s0, 128, %s22_s10, [#allocation3]  }
  0x23   :  { %s1509_s15 = scalar_lea.vmem %s41_s12, 6144  ;;  %p1514_p2 = scmp.lt.s32.totalorder %s41_s12, %s41_s12 }
  0x24   :  { %p1510_p1 = scmp.ne.s32.totalorder %s41_s12, %s1509_s15  ;;  %p1515_p3 = scmp.lt.s32.totalorder %s1509_s15, %s1509_s15 }
  0x26   :  { %p1516_p4 = por %p1515_p3, %p1514_p2 }
  0x28   :  { %p1517_p5 = pnand %p1516_p4, %p1510_p1 }
  0x2a   :  { %1520 = shalt.err (!%p1517_p5)
}
  0x2b   :  { %s1575_s3 = smov 192   ;;  %s1576_s16 = smov 12  }
  0x2c   :  { %46 = dma.hbm_to_vmem [thread:$0]  %s1714_s2, 6144, %s41_s12, [#allocation6], %s1575_s3, %s1575_s3, %s1576_s16  }
  0x2d   :  { %s1577_s19 = smov [#allocation10]  }
  0x2e   :  { %s67_s20 = sshll.u32 %s1577_s19, 4  ;;  %s68_s20 = int_to_ptr.vmem [resolvable:$true] %s67_s20 }
  0x2f   :  { %s1529_s21 = scalar_lea.vmem %s68_s20, 96  ;;  %p1534_p7 = scmp.lt.s32.totalorder %s68_s20, %s68_s20 }
  0x30   :  { %p1530_p6 = scmp.ne.s32.totalorder %s68_s20, %s1529_s21  ;;  %p1535_p8 = scmp.lt.s32.totalorder %s1529_s21, %s1529_s21 }
  0x32   :  { %p1536_p9 = por %p1535_p8, %p1534_p7 }
  0x34   :  { %p1537_p10 = pnand %p1536_p9, %p1530_p6 }
  0x36   :  { %1540 = shalt.err (!%p1537_p10)
}
  0x37   :  { %70 = dma.hbm_to_vmem [thread:$0]  %s1717_s5, 96, %s68_s20, [#allocation9]  }
  0x38   :  { %1561 = dma.done.wait [#allocation3], 128  }
  0x39   :  { %1562 = vsyncadd [#allocation3], 4294967168 }
  0x3a   :  { %1563 = dma.done.wait [#allocation6], 6272  }
  0x3b   :  { %1564 = vsyncadd [#allocation6], 4294961024 }
  0x3c   :  { %1565 = dma.done.wait [#allocation9], 6240  }
  0x3d   :  { %1566 = vsyncadd [#allocation9], 4294961056  ;;  %v1578_v0 = vmov 0   ;;  %v1285_v1 = vld [vmem:[#allocation8 + $0x154] ss:$24 sps:$4 sm:$0xff]   ;;  %vm1580_vm0 = vmmov 0  }
  0x3e   :  { %441 = vmatprep.mubr.bf16.mxu0 %v1578_v0  ;;  %482 = vmatprep.mubr.bf16.mxu1 %v1578_v0  ;;  %v1287_v2 = vld [vmem:[#allocation8 + $0x15c] ss:$24 sps:$4 sm:$0xff]   ;;  %v1289_v3 = vld [vmem:[#allocation8 + $0x150] ss:$24 sps:$4 sm:$0xff]   ;;  %v1293_v6 = vld [vmem:[#allocation8 + $0x12c] ss:$24 sps:$4 sm:$0xff]  }
  0x3f   :  { %409 = vmatprep.subr.bf16.mxu0 %v1285_v1  ;;  %v1290_v4 = vld [vmem:[#allocation8 + $0x158] ss:$24 sps:$4 sm:$0xff]   ;;  %450 = vmatprep.subr.bf16.mxu1 %v1287_v2  ;;  %v1291_v5 = vld [vmem:[#allocation8 + $0x124] ss:$24 sps:$4 sm:$0xff]   ;;  %v1296_v8 = vld [vmem:[#allocation8 + $0x128] ss:$24 sps:$4 sm:$0xff]  }
  0x40   :  { %410 = vmatpush1.bf16.msra.mxu0 %v1289_v3  ;;  %451 = vmatpush1.bf16.msra.mxu1 %v1290_v4  ;;  %v1295_v7 = vld [vmem:[#allocation8 + $0x120] ss:$24 sps:$4 sm:$0xff]   ;;  %v1297_v9 = vld [vmem:[#allocation8 + $0xf4] ss:$24 sps:$4 sm:$0xff]   ;;  %v1301_v11 = vld [vmem:[#allocation8 + $0xf0] ss:$24 sps:$4 sm:$0xff]  }
  0x41   :  { %411 = vmatprep.subr.bf16.mxu0 %v1291_v5  ;;  %452 = vmatprep.subr.bf16.mxu1 %v1293_v6  ;;  %v1299_v10 = vld [vmem:[#allocation8 + $0xfc] ss:$24 sps:$4 sm:$0xff]   ;;  %v1302_v12 = vld [vmem:[#allocation8 + $0xf8] ss:$24 sps:$4 sm:$0xff]   ;;  %v1305_v14 = vld [vmem:[#allocation8 + $0xcc] ss:$24 sps:$4 sm:$0xff]  }
  0x42   :  { %v1303_v13 = vld [vmem:[#allocation8 + $0xc4] ss:$24 sps:$4 sm:$0xff]   ;;  %v1307_v15 = vld [vmem:[#allocation8 + $0xc0] ss:$24 sps:$4 sm:$0xff]   ;;  %v1309_v17 = vld [vmem:[#allocation8 + $0x94] ss:$24 sps:$4 sm:$0xff]  }
  0x43   :  { %v1308_v16 = vld [vmem:[#allocation8 + $0xc8] ss:$24 sps:$4 sm:$0xff]   ;;  %v1311_v18 = vld [vmem:[#allocation8 + $0x9c] ss:$24 sps:$4 sm:$0xff]   ;;  %v1314_v20 = vld [vmem:[#allocation8 + $0x98] ss:$24 sps:$4 sm:$0xff]  }
  0x44   :  { %412 = vmatpush1.bf16.msra.mxu0 %v1295_v7  ;;  %453 = vmatpush1.bf16.msra.mxu1 %v1296_v8  ;;  %v1313_v19 = vld [vmem:[#allocation8 + $0x90] ss:$24 sps:$4 sm:$0xff]   ;;  %v1315_v21 = vld [vmem:[#allocation8 + $0x64] ss:$24 sps:$4 sm:$0xff]   ;;  %v1319_v23 = vld [vmem:[#allocation8 + $0x60] ss:$24 sps:$4 sm:$0xff]  }
  0x45   :  { %413 = vmatprep.subr.bf16.mxu0 %v1297_v9  ;;  %454 = vmatprep.subr.bf16.mxu1 %v1299_v10  ;;  %v1317_v22 = vld [vmem:[#allocation8 + $0x6c] ss:$24 sps:$4 sm:$0xff]   ;;  %v1320_v24 = vld [vmem:[#allocation8 + $0x68] ss:$24 sps:$4 sm:$0xff]   ;;  %v1323_v26 = vld [vmem:[#allocation8 + $0x3c] ss:$24 sps:$4 sm:$0xff]  }
  0x46   :  { %v1321_v25 = vld [vmem:[#allocation8 + $0x34] ss:$24 sps:$4 sm:$0xff]   ;;  %v1325_v27 = vld [vmem:[#allocation8 + $0x30] ss:$24 sps:$4 sm:$0xff]   ;;  %v1327_v29 = vld [vmem:[#allocation8 + $0x4] ss:$24 sps:$4 sm:$0xff]  }
  0x47   :  { %v1326_v28 = vld [vmem:[#allocation8 + $0x38] ss:$24 sps:$4 sm:$0xff]   ;;  %v1329_v30 = vld [vmem:[#allocation8 + $0xc] ss:$24 sps:$4 sm:$0xff]   ;;  %v1332_v32 = vld [vmem:[#allocation8 + $0x8] ss:$24 sps:$4 sm:$0xff]  }
  0x48   :  { %414 = vmatpush1.bf16.msra.mxu0 %v1301_v11  ;;  %455 = vmatpush1.bf16.msra.mxu1 %v1302_v12  ;;  %v1331_v31 = vld [vmem:[#allocation8] ss:$24 sps:$4 sm:$0xff]   ;;  %v1634_v33 = vld [vmem:[#allocation2] sm:$0xff]  ;;  %v1335_v34 = vld [vmem:[#allocation8 + $0x164] ss:$24 sps:$4 sm:$0xff]   ;;  %v1579_v7 = vmov 0.0  }
  0x49   :  { %415 = vmatprep.subr.bf16.mxu0 %v1303_v13  ;;  %456 = vmatprep.subr.bf16.mxu1 %v1305_v14  ;;  %v1338_v35 = vld [vmem:[#allocation7 + $0xac] ss:$12 sps:$4 sm:$0xff]   ;;  %v1638_v36 = vpack.c.bf16 %v1634_v33, %v1634_v33  ;;  %v1336_v38 = vld [vmem:[#allocation7 + $0xa8] ss:$12 sps:$4 sm:$0xff]   ;;  %v1342_v42 = vld [vmem:[#allocation7 + $0x90] ss:$12 sps:$4 sm:$0xff]  }
  0x4a   :  { %v1333_v37 = vld [vmem:[#allocation8 + $0x160] ss:$24 sps:$4 sm:$0xff]   ;;  %v1341_v39 = vld [vmem:[#allocation8 + $0x134] ss:$24 sps:$4 sm:$0xff]   ;;  %v1339_v41 = vld [vmem:[#allocation8 + $0x130] ss:$24 sps:$4 sm:$0xff]  }
  0x4b   :  { %v1344_v40 = vld [vmem:[#allocation7 + $0x94] ss:$12 sps:$4 sm:$0xff]   ;;  %v1347_v43 = vld [vmem:[#allocation8 + $0x104] ss:$24 sps:$4 sm:$0xff]   ;;  %v1351_v49 = vld [vmem:[#allocation8 + $0xd0] ss:$24 sps:$4 sm:$0xff]  }
  0x4c   :  { %416 = vmatpush1.bf16.msra.mxu0 %v1307_v15  ;;  %457 = vmatpush1.bf16.msra.mxu1 %v1308_v16  ;;  %v1350_v44 = vld [vmem:[#allocation7 + $0x7c] ss:$12 sps:$4 sm:$0xff]   ;;  %v1345_v45 = vld [vmem:[#allocation8 + $0x100] ss:$24 sps:$4 sm:$0xff]   ;;  %v1353_v47 = vld [vmem:[#allocation8 + $0xd4] ss:$24 sps:$4 sm:$0xff]  }
  0x4d   :  { %417 = vmatprep.subr.bf16.mxu0 %v1309_v17  ;;  %458 = vmatprep.subr.bf16.mxu1 %v1311_v18  ;;  %v1348_v46 = vld [vmem:[#allocation7 + $0x78] ss:$12 sps:$4 sm:$0xff]   ;;  %v1354_v50 = vld [vmem:[#allocation7 + $0x60] ss:$12 sps:$4 sm:$0xff]   ;;  %v1360_v54 = vld [vmem:[#allocation7 + $0x48] ss:$12 sps:$4 sm:$0xff]  }
  0x4e   :  { %v1356_v48 = vld [vmem:[#allocation7 + $0x64] ss:$12 sps:$4 sm:$0xff]   ;;  %v1362_v52 = vld [vmem:[#allocation7 + $0x4c] ss:$12 sps:$4 sm:$0xff]   ;;  %v1368_v56 = vld [vmem:[#allocation7 + $0x34] ss:$12 sps:$4 sm:$0xff]  }
  0x4f   :  { %v1359_v51 = vld [vmem:[#allocation8 + $0xa4] ss:$24 sps:$4 sm:$0xff]   ;;  %v1357_v53 = vld [vmem:[#allocation8 + $0xa0] ss:$24 sps:$4 sm:$0xff]   ;;  %v1365_v55 = vld [vmem:[#allocation8 + $0x74] ss:$24 sps:$4 sm:$0xff]  }
  0x50   :  { %418 = vmatpush1.bf16.msra.mxu0 %v1313_v19  ;;  %459 = vmatpush1.bf16.msra.mxu1 %v1314_v20  ;;  %v1363_v57 = vld [vmem:[#allocation8 + $0x70] ss:$24 sps:$4 sm:$0xff]   ;;  %v1371_v59 = vld [vmem:[#allocation8 + $0x44] ss:$24 sps:$4 sm:$0xff]   ;;  %v1369_v61 = vld [vmem:[#allocation8 + $0x40] ss:$24 sps:$4 sm:$0xff]  }
  0x51   :  { %419 = vmatprep.subr.bf16.mxu0 %v1315_v21  ;;  %460 = vmatprep.subr.bf16.mxu1 %v1317_v22  ;;  %v1366_v58 = vld [vmem:[#allocation7 + $0x30] ss:$12 sps:$4 sm:$0xff]   ;;  %v1372_v62 = vld [vmem:[#allocation7 + $0x18] ss:$12 sps:$4 sm:$0xff]   ;;  %v1377_v63 = vld [vmem:[#allocation8 + $0x14] ss:$24 sps:$4 sm:$0xff]  }
  0x52   :  { %v1374_v60 = vld [vmem:[#allocation7 + $0x1c] ss:$12 sps:$4 sm:$0xff]   ;;  %v1380_v1 = vld [vmem:[#allocation7 + $0x4] ss:$12 sps:$4 sm:$0xff]   ;;  %v1378_v3 = vld [vmem:[#allocation7] ss:$12 sps:$4 sm:$0xff]  }
  0x53   :  { %v1375_v2 = vld [vmem:[#allocation8 + $0x10] ss:$24 sps:$4 sm:$0xff]   ;;  %v532_v4 = vld [vmem:[#allocation5] sm:$0xff]  ;;  %v1383_v9 = vld [vmem:[#allocation7 + $0x80] ss:$12 sps:$4 sm:$0xff]  }
  0x54   :  { %420 = vmatpush1.bf16.msra.mxu0 %v1319_v23  ;;  %461 = vmatpush1.bf16.msra.mxu1 %v1320_v24  ;;  %v533_v5 = vpack.c.bf16 %v532_v4, %v532_v4  ;;  %v1381_v6 = vld [vmem:[#allocation7 + $0xb0] ss:$12 sps:$4 sm:$0xff]   ;;  %v1382_v8 = vld [vmem:[#allocation7 + $0x98] ss:$12 sps:$4 sm:$0xff]   ;;  %v1384_v10 = vld [vmem:[#allocation7 + $0x68] ss:$12 sps:$4 sm:$0xff]  }
  0x55   :  { %421 = vmatprep.subr.bf16.mxu0 %v1321_v25  ;;  %462 = vmatprep.subr.bf16.mxu1 %v1323_v26  ;;  %v1385_v11 = vld [vmem:[#allocation7 + $0x50] ss:$12 sps:$4 sm:$0xff]   ;;  %v1386_v12 = vld [vmem:[#allocation7 + $0x38] ss:$12 sps:$4 sm:$0xff]   ;;  %v1387_v13 = vld [vmem:[#allocation7 + $0x20] ss:$12 sps:$4 sm:$0xff]  }
  0x56   :  { %v1389_v14 = vld [vmem:[#allocation7 + $0x168] ss:$12 sps:$4 sm:$0xff]   ;;  %v1391_v15 = vld [vmem:[#allocation7 + $0x16c] ss:$12 sps:$4 sm:$0xff]   ;;  %v1392_v16 = vld [vmem:[#allocation7 + $0x170] ss:$12 sps:$4 sm:$0xff]  }
  0x57   :  { %v1395_v17 = vld [vmem:[#allocation7 + $0x154] ss:$12 sps:$4 sm:$0xff]   ;;  %v1393_v18 = vld [vmem:[#allocation7 + $0x150] ss:$12 sps:$4 sm:$0xff]   ;;  %v1396_v19 = vld [vmem:[#allocation7 + $0x158] ss:$12 sps:$4 sm:$0xff]  }
  0x58   :  { %422 = vmatpush1.bf16.msra.mxu0 %v1325_v27  ;;  %463 = vmatpush1.bf16.msra.mxu1 %v1326_v28  ;;  %v1399_v20 = vld [vmem:[#allocation7 + $0x13c] ss:$12 sps:$4 sm:$0xff]   ;;  %v1397_v21 = vld [vmem:[#allocation7 + $0x138] ss:$12 sps:$4 sm:$0xff]   ;;  %v1400_v22 = vld [vmem:[#allocation7 + $0x140] ss:$12 sps:$4 sm:$0xff]  }
  0x59   :  { %423 = vmatprep.subr.bf16.mxu0 %v1327_v29  ;;  %464 = vmatprep.subr.bf16.mxu1 %v1329_v30  ;;  %v1403_v23 = vld [vmem:[#allocation7 + $0x124] ss:$12 sps:$4 sm:$0xff]   ;;  %v1401_v24 = vld [vmem:[#allocation7 + $0x120] ss:$12 sps:$4 sm:$0xff]   ;;  %v1404_v25 = vld [vmem:[#allocation7 + $0x128] ss:$12 sps:$4 sm:$0xff]  }
  0x5a   :  { %v1407_v26 = vld [vmem:[#allocation7 + $0x10c] ss:$12 sps:$4 sm:$0xff]   ;;  %v1405_v27 = vld [vmem:[#allocation7 + $0x108] ss:$12 sps:$4 sm:$0xff]   ;;  %v1408_v28 = vld [vmem:[#allocation7 + $0x110] ss:$12 sps:$4 sm:$0xff]  }
  0x5b   :  { %v1411_v29 = vld [vmem:[#allocation7 + $0xf4] ss:$12 sps:$4 sm:$0xff]   ;;  %v1409_v30 = vld [vmem:[#allocation7 + $0xf0] ss:$12 sps:$4 sm:$0xff]  }
  0x5c   :  { %424 = vmatpush1.bf16.msra.mxu0 %v1331_v31  ;;  %465 = vmatpush1.bf16.msra.mxu1 %v1332_v32  ;;  %v1412_v31 = vld [vmem:[#allocation7 + $0xf8] ss:$12 sps:$4 sm:$0xff]   ;;  %v1415_v32 = vld [vmem:[#allocation7 + $0xdc] ss:$12 sps:$4 sm:$0xff]  }
  0x5d   :  { %491 = vmatprep.subr.bf16.mxu0 %v1335_v34  ;;  %711 = vmatprep.subr.bf16.mxu1 %v1338_v35  ;;  %v1413_v34 = vld [vmem:[#allocation7 + $0xd8] ss:$12 sps:$4 sm:$0xff]   ;;  %v1416_v35 = vld [vmem:[#allocation7 + $0xe0] ss:$12 sps:$4 sm:$0xff]  }
  0x5f   :  { %442 = vmatmul.mubr.bf16.vlgmr.msra.gmra.mxu0 %v1638_v36  ;;  %483 = vmatmul.mubr.bf16.vlgmr.msra.gmra.mxu1 %v1638_v36 }
  0x60   :  { %492 = vmatpush1.bf16.msra.mxu0 %v1333_v37  ;;  %712 = vmatpush1.bf16.msra.mxu1 %v1336_v38  ;;  %v1417_v37 = vld [vmem:[#allocation7 + $0xc0] ss:$12 sps:$4 sm:$0xff]   ;;  %v1420_v38 = vld [vmem:[#allocation7 + $0xc8] ss:$12 sps:$4 sm:$0xff]  }
  0x61   :  { %493 = vmatprep.subr.bf16.mxu0 %v1341_v39  ;;  %713 = vmatprep.subr.bf16.mxu1 %v1344_v40 }
  0x62   :  { %523 = vmatprep.mubr.bf16.mxu0 %v1578_v0  ;;  %743 = vmatprep.mubr.bf16.mxu1 %v1578_v0 }
  0x64   :  { %494 = vmatpush1.bf16.msra.mxu0 %v1339_v41  ;;  %714 = vmatpush1.bf16.msra.mxu1 %v1342_v42 }
  0x65   :  { %495 = vmatprep.subr.bf16.mxu0 %v1347_v43  ;;  %715 = vmatprep.subr.bf16.mxu1 %v1350_v44 }
  0x68   :  { %496 = vmatpush1.bf16.msra.mxu0 %v1345_v45  ;;  %716 = vmatpush1.bf16.msra.mxu1 %v1348_v46 }
  0x69   :  { %497 = vmatprep.subr.bf16.mxu0 %v1353_v47  ;;  %717 = vmatprep.subr.bf16.mxu1 %v1356_v48  ;;  %v139_v47 = vlaneseq }
  0x6b   :  { %v1668_v48 = vshrl.u32 %v139_v47, 7 }
  0x6c   :  { %498 = vmatpush1.bf16.msra.mxu0 %v1351_v49  ;;  %718 = vmatpush1.bf16.msra.mxu1 %v1354_v50  ;;  %v566_v50 = vld [vmem:[%s1716_s4] sm:$0x7] }
  0x6d   :  { %499 = vmatprep.subr.bf16.mxu0 %v1359_v51  ;;  %719 = vmatprep.subr.bf16.mxu1 %v1362_v52  ;;  %v1671_v49 = vsub.s32 0, %v1668_v48  ;;  %v1676_v51 = vld [vmem:[#allocation10] sm:$0x3f] }
  0x6f   :  { %v142_v52 = vrot.slane %v1676_v51, %v1671_v49 }
  0x70   :  { %500 = vmatpush1.bf16.msra.mxu0 %v1357_v53  ;;  %720 = vmatpush1.bf16.msra.mxu1 %v1360_v54  ;;  %v571_v53 = vrot.slane %v566_v50, %v1671_v49  ;;  %v1682_v54 = vsub.s32 1, %v1668_v48 }
  0x71   :  { %501 = vmatprep.subr.bf16.mxu0 %v1365_v55  ;;  %721 = vmatprep.subr.bf16.mxu1 %v1368_v56 }
  0x74   :  { %502 = vmatpush1.bf16.msra.mxu0 %v1363_v57  ;;  %722 = vmatpush1.bf16.msra.mxu1 %v1366_v58 }
  0x75   :  { %503 = vmatprep.subr.bf16.mxu0 %v1371_v59  ;;  %723 = vmatprep.subr.bf16.mxu1 %v1374_v60  ;;  %v575_v59 = vrot.slane %v566_v50, %v1682_v54 }
  0x78   :  { %504 = vmatpush1.bf16.msra.mxu0 %v1369_v61  ;;  %724 = vmatpush1.bf16.msra.mxu1 %v1372_v62  ;;  %v146_v62 = vrot.slane %v1676_v51, %v1682_v54 }
  0x79   :  { %505 = vmatprep.subr.bf16.mxu0 %v1377_v63  ;;  %725 = vmatprep.subr.bf16.mxu1 %v1380_v1 }
  0x7c   :  { %506 = vmatpush1.bf16.msra.mxu0 %v1375_v2  ;;  %726 = vmatpush1.bf16.msra.mxu1 %v1378_v3 }
  0x7d   :  { %1232 = vmatprep.subr.bf16.mxu0 %v1579_v7  ;;  %993 = vmatprep.subr.bf16.mxu1 %v1391_v15 }
  0x7f   :  { %524 = vmatmul.mubr.bf16.vlgmr.msra.gmra.mxu0 %v1638_v36  ;;  %744 = vmatmul.mubr.bf16.vlgmr.msra.gmra.mxu1 %v533_v5  ;;  %v1419_v36 = vld [vmem:[#allocation7 + $0xc4] ss:$12 sps:$4 sm:$0xff]  }
  0x80   :  { %1233 = vmatpush3.bf16.msra.mxu0 %v1381_v6  ;;  %1248 = vmatprep.mubr.msk.bf16.mxu0 %vm1580_vm0, %v1579_v7 }
  0x81   :  { %1234 = vmatprep.subr.bf16.mxu0 %v1579_v7  ;;  %1025 = vmatprep.mubr.bf16.mxu1 %v1578_v0  ;;  %v1388_v0 = vld [vmem:[#allocation7 + $0x8] ss:$12 sps:$4 sm:$0xff]  }
  0x82   :  { %994 = vmatpush1.bf16.msra.mxu1 %v1389_v14 }
  0x83   :  { %995 = vmatprep.subr.bf16.mxu1 %v1395_v17 }
  0x84   :  { %1235 = vmatpush3.bf16.msra.mxu0 %v1382_v8 }
  0x85   :  { %1236 = vmatprep.subr.bf16.mxu0 %v1579_v7 }
  0x86   :  { %996 = vmatpush1.bf16.msra.mxu1 %v1393_v18 }
  0x87   :  { %997 = vmatprep.subr.bf16.mxu1 %v1399_v20 }
  0x88   :  { %1237 = vmatpush3.bf16.msra.mxu0 %v1383_v9 }
  0x89   :  { %1238 = vmatprep.subr.bf16.mxu0 %v1579_v7 }
  0x8a   :  { %998 = vmatpush1.bf16.msra.mxu1 %v1397_v21 }
  0x8b   :  { %999 = vmatprep.subr.bf16.mxu1 %v1403_v23 }
  0x8c   :  { %1239 = vmatpush3.bf16.msra.mxu0 %v1384_v10 }
  0x8d   :  { %1240 = vmatprep.subr.bf16.mxu0 %v1579_v7 }
  0x8e   :  { %1000 = vmatpush1.bf16.msra.mxu1 %v1401_v24 }
  0x8f   :  { %1001 = vmatprep.subr.bf16.mxu1 %v1407_v26 }
  0x90   :  { %1241 = vmatpush3.bf16.msra.mxu0 %v1385_v11 }
  0x91   :  { %1242 = vmatprep.subr.bf16.mxu0 %v1579_v7 }
  0x92   :  { %1002 = vmatpush1.bf16.msra.mxu1 %v1405_v27 }
  0x93   :  { %1003 = vmatprep.subr.bf16.mxu1 %v1411_v29 }
  0x94   :  { %1243 = vmatpush3.bf16.msra.mxu0 %v1386_v12  ;;  %v149_v12 = vsub.s32 2, %v1668_v48 }
  0x95   :  { %1244 = vmatprep.subr.bf16.mxu0 %v1579_v7 }
  0x96   :  { %1004 = vmatpush1.bf16.msra.mxu1 %v1409_v30  ;;  %v579_v14 = vrot.slane %v566_v50, %v149_v12 }
  0x97   :  { %1005 = vmatprep.subr.bf16.mxu1 %v1415_v32  ;;  %v153_v32 = vsub.s32 3, %v1668_v48 }
  0x98   :  { %1245 = vmatpush3.bf16.msra.mxu0 %v1387_v13 }
  0x99   :  { %1246 = vmatprep.subr.bf16.mxu0 %v1579_v7 }
  0x9a   :  { %1006 = vmatpush1.bf16.msra.mxu1 %v1413_v34  ;;  %v1187_v34 = vld [vmem:[%s1716_s4 + $0x3] sm:$0x7]  ;;  %s1581_s4 = smov [#allocation11]  }
  0x9b   :  { %1007 = vmatprep.subr.bf16.mxu1 %v1419_v36  ;;  %v853_v36 = vrot.slane %v1187_v34, %v1671_v49  ;;  %s1102_s25 = sshll.u32 %s1581_s4, 4  ;;  %s1103_s25 = int_to_ptr.vmem [resolvable:$true] %s1102_s25 }
  0x9c   :  { %1247 = vmatpush3.bf16.msra.mxu0 %v1388_v0  ;;  %v150_v0 = vrot.slane %v1676_v51, %v149_v12  ;;  %s1541_s26 = scalar_lea.vmem %s1103_s25, 128  ;;  %p1546_p12 = scmp.lt.s32.totalorder %s1103_s25, %s1103_s25 }
  0x9d   :  { %1252 = vmatprep.subr.bf16.mxu0 %v1579_v7  ;;  %p1542_p11 = scmp.ne.s32.totalorder %s1103_s25, %s1541_s26  ;;  %p1547_p13 = scmp.lt.s32.totalorder %s1541_s26, %s1541_s26 }
  0x9e   :  { %1008 = vmatpush1.bf16.msra.mxu1 %v1417_v37  ;;  %v157_v37 = vsub.s32 4, %v1668_v48 }
  0x9f   :  { %1249 = vmatmul.mubr.bf16.vlgmr.msra.gmra.mxu0 %v533_v5  ;;  %p1548_p0 = por %p1547_p13, %p1546_p12 }
  0xa0   :  { %1268 = vmatprep.mubr.msk.bf16.mxu0 %vm1580_vm0, %v1579_v7  ;;  %1253 = vmatpush3.bf16.msra.mxu0 %v1392_v16 }
  0xa1   :  { %1254 = vmatprep.subr.bf16.mxu0 %v1579_v7  ;;  %p1549_p1 = pnand %p1548_p0, %p1542_p11 }
  0xa4   :  { %1255 = vmatpush3.bf16.msra.mxu0 %v1396_v19 }
  0xa5   :  { %1256 = vmatprep.subr.bf16.mxu0 %v1579_v7 }
  0xa8   :  { %1257 = vmatpush3.bf16.msra.mxu0 %v1400_v22 }
  0xa9   :  { %1258 = vmatprep.subr.bf16.mxu0 %v1579_v7 }
  0xac   :  { %1259 = vmatpush3.bf16.msra.mxu0 %v1404_v25 }
  0xad   :  { %1260 = vmatprep.subr.bf16.mxu0 %v1579_v7 }
  0xb0   :  { %1261 = vmatpush3.bf16.msra.mxu0 %v1408_v28 }
  0xb1   :  { %1262 = vmatprep.subr.bf16.mxu0 %v1579_v7 }
  0xb4   :  { %1263 = vmatpush3.bf16.msra.mxu0 %v1412_v31 }
  0xb5   :  { %1264 = vmatprep.subr.bf16.mxu0 %v1579_v7 }
  0xb8   :  { %1265 = vmatpush3.bf16.msra.mxu0 %v1416_v35  ;;  %v154_v35 = vrot.slane %v1676_v51, %v153_v32 }
  0xb9   :  { %1266 = vmatprep.subr.bf16.mxu0 %v1579_v7 }
  0xbc   :  { %1267 = vmatpush3.bf16.msra.mxu0 %v1420_v38 }
 0x11f   :  { %v443_v39 = vpop.f32.mrf.mxu0  ;;  %v484_v40 = vpop.f32.mrf.mxu1 }
 0x120   :  { %v444_v57 = vadd.f32 %v443_v39, %v142_v52  ;;  %v485_v18 = vadd.f32 %v484_v40, %v150_v0 }
 0x121   :  { %v445_v41 = vpop.f32.mrf.mxu0  ;;  %v1666_v42 = vpop.f32.mrf.mxu1 }
 0x122   :  { %v446_v7 = vadd.f32 %v445_v41, %v146_v62  ;;  %v487_v40 = vadd.f32 %v1666_v42, %v154_v35 }
 0x123   :  { %v447_v43 = vpop.f32.mrf.mxu0  ;;  %v488_v44 = vpop.f32.mrf.mxu1 }
 0x124   :  { %v857_v43 = vrot.slane %v1187_v34, %v1682_v54  ;;  %v161_v54 = vsub.s32 5, %v1668_v48 }
 0x125   :  { %v448_v45 = vpop.f32.mrf.mxu0  ;;  %v489_v46 = vpop.f32.mrf.mxu1 }
 0x126   :  { %v158_v46 = vrot.slane %v1676_v51, %v157_v37 }
 0x13f   :  { %v1684_v55 = vpop.f32.mrf.mxu0  ;;  %v745_v56 = vpop.f32.mrf.mxu1 }
 0x140   :  { %v746_v58 = vadd.f32 %v745_v56, %v571_v53 }
 0x141   :  { %v1687_v60 = vpop.f32.mrf.mxu0  ;;  %v747_v61 = vpop.f32.mrf.mxu1 }
 0x142   :  { %v792_v63 = vadd.f32 %v746_v58, %v444_v57  ;;  %v748_v4 = vadd.f32 %v747_v61, %v575_v59  ;;  %v526_v58 = vadd.f32 %v1684_v55, %v158_v46 }
 0x143   :  { %v529_v1 = vpop.f32.mrf.mxu0  ;;  %v749_v2 = vpop.f32.mrf.mxu1 }
 0x144   :  { %v1185_v3 = vmul.f32 -1.442695, %v792_v63  ;;  %v799_v8 = vadd.f32 %v748_v4, %v446_v7  ;;  %v162_v1 = vrot.slane %v1676_v51, %v161_v54  ;;  %v861_v2 = vrot.slane %v1187_v34, %v149_v12 }
 0x145   :  { %v530_v5 = vpop.f32.mrf.mxu0  ;;  %v750_v6 = vpop.f32.mrf.mxu1 }
 0x146   :  { %1421 = vpow2.f32 %v1185_v3  ;;  %v1186_v9 = vmul.f32 -1.442695, %v799_v8  ;;  %v528_v4 = vadd.f32 %v1687_v60, %v162_v1 }
 0x148   :  { %1423 = vpow2.f32 %v1186_v9 }
 0x153   :  { %v1422_v10 = vpop.eup %1421 }
 0x154   :  { %v796_v11 = vadd.f32 1.0, %v1422_v10 }
 0x155   :  { %v1424_v13 = vpop.eup %1423 }
 0x156   :  { %1425 = vrcp.f32 %v796_v11  ;;  %v803_v16 = vadd.f32 1.0, %v1424_v13 }
 0x158   :  { %1427 = vrcp.f32 %v803_v16 }
 0x15f   :  { %v786_v15 = vpop.f32.mrf.mxu0 }
 0x160   :  { %v787_v19 = vadd.f32 %v786_v15, %v579_v14 }
 0x161   :  { %v1250_v17 = vpop.f32.mrf.mxu0 }
 0x163   :  { %v1426_v20 = vpop.eup %1425  ;;  %v789_v21 = vpop.f32.mrf.mxu0 }
 0x164   :  { %v806_v22 = vmul.f32 %v1426_v20, %v485_v18 }
 0x165   :  { %v1251_v23 = vpop.f32.mrf.mxu0  ;;  %v1428_v25 = vpop.eup %1427 }
 0x166   :  { %v807_v24 = vadd.f32 %v806_v22, %v787_v19  ;;  %v809_v26 = vsub.f32 1.0, %v1428_v25  ;;  %v811_v29 = vmul.f32 %v1428_v25, %v1634_v33 }
 0x168   :  { %1429 = vtanh.f32 %v807_v24 }
 0x175   :  { %v1430_v27 = vpop.eup %1429 }
 0x176   :  { %v810_v28 = vmul.f32 %v1430_v27, %v809_v26 }
 0x178   :  { %v812_v30 = vadd.f32 %v811_v29, %v810_v28 }
 0x17a   :  { %v813_v31 = vpack.c.bf16 %v812_v30, %v812_v30 }
 0x17c   :  { %1026 = vmatmul.mubr.bf16.vlgmr.msra.gmra.mxu1 %v813_v31  ;;  %1269 = vmatmul.mubr.bf16.vlgmr.msra.gmra.mxu0 %v813_v31 }
 0x23c   :  { %v1027_v38 = vpop.f32.mrf.mxu1  ;;  %v1068_v39 = vpop.f32.mrf.mxu0 }
 0x23d   :  { %v1028_v41 = vadd.f32 %v1027_v38, %v853_v36  ;;  %v1069_v6 = vadd.f32 %v1068_v39, %v861_v2 }
 0x23e   :  { %v1029_v44 = vpop.f32.mrf.mxu1  ;;  %v1270_v45 = vpop.f32.mrf.mxu0 }
 0x23f   :  { %v1074_v47 = vadd.f32 %v1028_v41, %v487_v40  ;;  %v1030_v56 = vadd.f32 %v1029_v44, %v857_v43 }
 0x240   :  { %v1031_v50 = vpop.f32.mrf.mxu1  ;;  %v1071_v52 = vpop.f32.mrf.mxu0 }
 0x241   :  { %v1212_v53 = vmul.f32 -1.442695, %v1074_v47  ;;  %v1081_v59 = vadd.f32 %v1030_v56, %v526_v58 }
 0x242   :  { %v1032_v57 = vpop.f32.mrf.mxu1  ;;  %v1271_v49 = vpop.f32.mrf.mxu0 }
 0x243   :  { %1431 = vpow2.f32 %v1212_v53  ;;  %v1213_v61 = vmul.f32 -1.442695, %v1081_v59 }
 0x245   :  { %1433 = vpow2.f32 %v1213_v61 }
 0x250   :  { %v1432_v42 = vpop.eup %1431 }
 0x251   :  { %v1078_v62 = vadd.f32 1.0, %v1432_v42 }
 0x252   :  { %v1434_v63 = vpop.eup %1433 }
 0x253   :  { %1435 = vrcp.f32 %v1078_v62  ;;  %v1085_v3 = vadd.f32 1.0, %v1434_v63 }
 0x255   :  { %1437 = vrcp.f32 %v1085_v3 }
 0x260   :  { %v1436_v5 = vpop.eup %1435 }
 0x261   :  { %v1088_v7 = vmul.f32 %v1436_v5, %v528_v4 }
 0x262   :  { %v1438_v8 = vpop.eup %1437 }
 0x263   :  { %v1089_v55 = vadd.f32 %v1088_v7, %v1069_v6  ;;  %v1091_v9 = vsub.f32 1.0, %v1438_v8  ;;  %v1093_v48 = vmul.f32 %v1438_v8, %v1634_v33 }
 0x265   :  { %1439 = vtanh.f32 %v1089_v55 }
 0x272   :  { %v1440_v10 = vpop.eup %1439 }
 0x273   :  { %v1092_v11 = vmul.f32 %v1440_v10, %v1091_v9 }
 0x275   :  { %v1094_v13 = vadd.f32 %v1093_v48, %v1092_v11 }
 0x277   :  { %1095 = vst [vmem:[#allocation11] sm:$0xff] %v1094_v13 }
 0x278   :  { %1552 = shalt.err (!%p1549_p1)
}
 0x279   :  { %1105 = dma.vmem_to_hbm [thread:$0]  %s1103_s25, 128, %s1718_s6, [#allocation4]  }
 0x27a   :  { %1567 = dma.done.wait [#allocation4], 128  }
 0x27b   :  { %1568 = vsyncadd [#allocation4], 4294967168 }
 0x27c   :  { %1109 = vsyncpa [#allocation3], 1 }
 0x27d   :  { %1110 = vsyncpa [#allocation6], 1 }
 0x27e   :  { %1111 = vsyncpa [#allocation9], 1 }
 0x27f   :  { %1112 = vsyncpa [#allocation4], 1 }

</bundles_post_ra>
